<compile_context>
chip_gen: v7x
topology: tpu7x:2x2x1
jax: 0.10.0
libtpu: 0.0.40
codegen_flags: <defaults>
</compile_context>

<pallas_src>
import functools

import jax
import jax.numpy as jnp
from jax.experimental import pallas as pl
from jax.experimental.pallas import tpu as pltpu

_LANE = 128
_VMEM_LIMIT = 48 * 1024 * 1024    # safe on v5e/v6e (128 MiB) and v7x (64 MiB)
_VMEM_BUDGET = 40 * 1024 * 1024   # sizing target for block selection


# --------------------------------------------------------------------------
# Kernels
# --------------------------------------------------------------------------
def linear_kernel(x_ref, w_ref, b_ref, o_ref):
    """One row tile: o = x @ W + b (bf16 operands, f32 accumulate)."""
    acc = jnp.dot(x_ref[...], w_ref[...], preferred_element_type=jnp.float32)
    o_ref[...] = (acc + b_ref[...]).astype(o_ref.dtype)


def agg_relu_linear_kernel(adj_ref, h_ref, w2_ref, b2_ref, o_ref):
    """Full-K aggregation of one adj row stripe, fused with the 2nd linear.

    o = relu(adj_stripe @ h) @ W2 + b2   (relu in f32, matmuls bf16->f32)
    """
    acc = jnp.dot(adj_ref[...], h_ref[...], preferred_element_type=jnp.float32)
    h1 = jnp.maximum(acc, 0.0).astype(jnp.bfloat16)
    z0 = jnp.dot(h1, w2_ref[...], preferred_element_type=jnp.float32)
    o_ref[...] = (z0 + b2_ref[...]).astype(o_ref.dtype)


def agg_logsoftmax_kernel(adj_ref, z_ref, o_ref, *, nclass):
    """o = log_softmax(adj_stripe @ z) over the first `nclass` columns.

    Columns >= nclass are zero padding and are masked out of the softmax.
    """
    acc = jnp.dot(adj_ref[...], z_ref[...], preferred_element_type=jnp.float32)
    cols = jax.lax.broadcasted_iota(jnp.int32, acc.shape, 1)
    valid = cols < nclass
    zm = jnp.where(valid, acc, -jnp.inf)
    m = jnp.max(zm, axis=1, keepdims=True)
    s = zm - m
    lse = jnp.log(jnp.sum(jnp.exp(s), axis=1, keepdims=True))
    o_ref[...] = jnp.where(valid, s - lse, 0.0).astype(o_ref.dtype)


# --------------------------------------------------------------------------
# Block-size selection (VMEM-budget aware; cares about v7x's 64 MiB VMEM)
# --------------------------------------------------------------------------
def _pick_row_tile(np_, hp, cp, budget_bytes):
    """Largest row tile whose double-buffered adj stripe + resident operands
    fit the budget; prefer >= 2 row tiles so both v7x TensorCores get work."""
    resident = 2 * (np_ * hp * 2 + hp * cp * 2 + cp * 4)   # h, W2, b2 (x2 buf)
    fitting = []
    for rt in (512, 256, 128):
        if np_ % rt:
            continue
        per_step = 2 * rt * np_ * 2 + 2 * rt * cp * 4      # adj stripe + out
        if resident + per_step <= budget_bytes:
            fitting.append(rt)
    if not fitting:
        return 128
    for rt in fitting:
        if np_ // rt >= 2:
            return rt
    return fitting[-1]


# --------------------------------------------------------------------------
# pallas_call wrappers
# --------------------------------------------------------------------------
def _linear(x_p, w_p, b_p, out_dtype, rt):
    np_, f_in = x_p.shape
    f_out = w_p.shape[1]
    return pl.pallas_call(
        linear_kernel,
        out_shape=jax.ShapeDtypeStruct((np_, f_out), out_dtype),
        grid=(np_ // rt,),
        in_specs=[
            pl.BlockSpec((rt, f_in), lambda i: (i, 0)),
            pl.BlockSpec((f_in, f_out), lambda i: (0, 0)),   # W resident
            pl.BlockSpec((1, f_out), lambda i: (0, 0)),      # b resident
        ],
        out_specs=pl.BlockSpec((rt, f_out), lambda i: (i, 0)),
        compiler_params=pltpu.CompilerParams(
            dimension_semantics=("parallel",),
            vmem_limit_bytes=_VMEM_LIMIT,
        ),
        cost_estimate=pl.CostEstimate(
            flops=2 * np_ * f_in * f_out,
            transcendentals=0,
            bytes_accessed=(np_ * f_in * 2 + f_in * f_out * 2
                            + f_out * 4 + np_ * f_out * 2),
        ),
    )(x_p, w_p, b_p)


def _agg_fused(adj_p, h_p, w2_p, b2_p, out_dtype, rt):
    """z0 = relu(adj @ h) @ W2 + b2, one pallas_call, 1-D row-tile grid."""
    np_ = adj_p.shape[0]
    hp = h_p.shape[1]
    cp = w2_p.shape[1]
    return pl.pallas_call(
        agg_relu_linear_kernel,
        out_shape=jax.ShapeDtypeStruct((np_, cp), out_dtype),
        grid=(np_ // rt,),
        in_specs=[
            pl.BlockSpec((rt, np_), lambda i: (i, 0)),   # adj row stripe (streamed)
            pl.BlockSpec((np_, hp), lambda i: (0, 0)),   # features, resident
            pl.BlockSpec((hp, cp), lambda i: (0, 0)),    # W2, resident
            pl.BlockSpec((1, cp), lambda i: (0, 0)),     # b2, resident
        ],
        out_specs=pl.BlockSpec((rt, cp), lambda i: (i, 0)),
        compiler_params=pltpu.CompilerParams(
            dimension_semantics=("parallel",),
            vmem_limit_bytes=_VMEM_LIMIT,
        ),
        cost_estimate=pl.CostEstimate(
            flops=2 * np_ * np_ * hp + 2 * np_ * hp * cp,
            transcendentals=0,
            bytes_accessed=(np_ * np_ * 2 + np_ * hp * 2
                            + hp * cp * 2 + cp * 4 + np_ * cp * 2),
        ),
    )(adj_p, h_p, w2_p, b2_p)


def _agg_logsoftmax(adj_p, z_p, nclass, out_dtype, rt):
    """out = log_softmax(adj @ z) over the first nclass columns."""
    np_ = adj_p.shape[0]
    cp = z_p.shape[1]
    return pl.pallas_call(
        functools.partial(agg_logsoftmax_kernel, nclass=nclass),
        out_shape=jax.ShapeDtypeStruct((np_, cp), out_dtype),
        grid=(np_ // rt,),
        in_specs=[
            pl.BlockSpec((rt, np_), lambda i: (i, 0)),   # adj row stripe (streamed)
            pl.BlockSpec((np_, cp), lambda i: (0, 0)),   # features, resident
        ],
        out_specs=pl.BlockSpec((rt, cp), lambda i: (i, 0)),
        compiler_params=pltpu.CompilerParams(
            dimension_semantics=("parallel",),
            vmem_limit_bytes=_VMEM_LIMIT,
        ),
        cost_estimate=pl.CostEstimate(
            flops=2 * np_ * np_ * cp,
            transcendentals=np_ * cp,
            bytes_accessed=(np_ * np_ * 2 + np_ * cp * 2 + np_ * cp * 4),
        ),
    )(adj_p, z_p)


def gcn_forward(x, adj, w1, b1, w2, b2):
    """x: (N, nfeat), adj: (N, N) dense, w1: (nfeat, nhid), b1: (nhid,),
       w2: (nhid, nclass), b2: (nclass,) -> (N, nclass) f32 log-probs."""
    n, f = x.shape
    h = w1.shape[1]
    c = w2.shape[1]

    np_ = pl.cdiv(n, _LANE) * _LANE        # pad node count to lane multiple
    hp = pl.cdiv(h, _LANE) * _LANE         # pad hidden dim to lane width
    cp = pl.cdiv(c, _LANE) * _LANE         # pad class dim to lane width

    rt = _pick_row_tile(np_, hp, cp, _VMEM_BUDGET)

    # bf16 matmul operands in HBM (adj is the dominant traffic); f32 biases.
    x_p = jnp.zeros((np_, f), jnp.bfloat16).at[:n].set(x.astype(jnp.bfloat16))
    adj_p = jnp.zeros((np_, np_), jnp.bfloat16).at[:n, :n].set(
        adj.astype(jnp.bfloat16))
    w1_p = jnp.zeros((f, hp), jnp.bfloat16).at[:, :h].set(
        w1.astype(jnp.bfloat16))
    b1_p = jnp.zeros((1, hp), jnp.float32).at[:, :h].set(
        jnp.reshape(b1, (1, -1)).astype(jnp.float32))
    w2_p = jnp.zeros((hp, cp), jnp.bfloat16).at[:h, :c].set(
        w2.astype(jnp.bfloat16))
    b2_p = jnp.zeros((1, cp), jnp.float32).at[:, :c].set(
        jnp.reshape(b2, (1, -1)).astype(jnp.float32))

    # layer-1 linear (hoisted out of the adj stream)
    h0 = _linear(x_p, w1_p, b1_p, jnp.bfloat16, rt)
    # layer-1 aggregation + relu, fused with the layer-2 linear
    z0 = _agg_fused(adj_p, h0, w2_p, b2_p, jnp.bfloat16, rt)
    # layer-2 aggregation + masked log_softmax
    out_p = _agg_logsoftmax(adj_p, z0, c, jnp.float32, rt)

    return out_p[:n, :c]


# --------------------------------------------------------------------------
# Reference + test
# --------------------------------------------------------------------------
def gcn_reference(x, adj, w1, b1, w2, b2):
    """Plain-JAX reference mirroring the kernel's bf16 operand roundtrips."""
    bf = lambda t: t.astype(jnp.bfloat16).astype(jnp.float32)
    xf, af = bf(x), bf(adj)
    h0 = bf(xf @ bf(w1) + jnp.reshape(b1, (1, -1)))
    h1 = bf(jnp.maximum(af @ h0, 0.0))
    z0 = bf(h1 @ bf(w2) + jnp.reshape(b2, (1, -1)))
    z = af @ z0
    return jax.nn.log_softmax(z, axis=1)


def xavier_uniform(key, out_features, in_features, gain):
    # matches nn.init.xavier_uniform_ on a (out, in) Linear weight
    bound = gain * (6.0 / (in_features + out_features)) ** 0.5
    return jax.random.uniform(
        key, (out_features, in_features), jnp.float32, -bound, bound)


if __name__ == "__main__":
    # small synthetic graph exercising real tiling: 2 row tiles of 128
    N, NFEAT, NHID, NCLASS = 256, 32, 16, 4

    key = jax.random.PRNGKey(0)
    k_x, k_adj, k_w1, k_w2 = jax.random.split(key, 4)

    # node features
    x = jax.random.normal(k_x, (N, NFEAT), jnp.float32)

    # deterministic dense adjacency: random edges + self loops, row-normalized
    a = (jax.random.uniform(k_adj, (N, N)) < 0.05).astype(jnp.float32)
    a = jnp.maximum(a, a.T)                      # symmetric
    a = a + jnp.eye(N, dtype=jnp.float32)        # self loops
    adj = a / jnp.sum(a, axis=1, keepdims=True)  # row-normalize

    # parameters (PyTorch Linear weight is (out, in); kernel uses (in, out))
    w1 = xavier_uniform(k_w1, NHID, NFEAT, gain=1.414).T    # (nfeat, nhid)
    w2 = xavier_uniform(k_w2, NCLASS, NHID, gain=1.414).T   # (nhid, nclass)
    b1 = jnp.zeros((NHID,), jnp.float32)
    b2 = jnp.zeros((NCLASS,), jnp.float32)

    out = gcn_forward(x, adj, w1, b1, w2, b2)
    jax.block_until_ready(out)

    ref = gcn_reference(x, adj, w1, b1, w2, b2)

    assert out.shape == (N, NCLASS)
    # log-probs should exponentiate-sum to 1 per row (softmax done in f32)
    row_sums = jnp.exp(out).sum(axis=1)
    assert jnp.allclose(row_sums, 1.0, atol=1e-5)
    # match the bf16-operand / f32-accumulate reference
    assert jnp.allclose(out, ref, atol=1e-2, rtol=1e-2)

    print("KERNEL_OK")
</pallas_src>

<mosaic_0001>
module attributes {stable_mosaic.version = 11 : i64} {
  func.func @linear_kernel(%arg0: i32, %arg1: memref<128x32xbf16, #tpu.memory_space<vmem>>, %arg2: memref<32x128xbf16, #tpu.memory_space<vmem>>, %arg3: memref<1x128xf32, #tpu.memory_space<vmem>>, %arg4: memref<128x128xbf16, #tpu.memory_space<vmem>>) attributes {dimension_semantics = [#tpu.dimension_semantics<parallel>], iteration_bounds = array<i64: 2>, scalar_prefetch = 0 : i64, scratch_operands = 0 : i64, tpu.core_type = #tpu.core_type<tc>, window_params = [{transform_indices = @transform_0, window_bounds = array<i64: 128, 32>}, {pipeline_mode = #tpu.pipeline_mode<synchronous>, transform_indices = @transform_1, window_bounds = array<i64: 32, 128>}, {pipeline_mode = #tpu.pipeline_mode<synchronous>, transform_indices = @transform_2, window_bounds = array<i64: 1, 128>}, {transform_indices = @transform_3, window_bounds = array<i64: 128, 128>}]} {
    %c0 = arith.constant 0 : index
    %c0_0 = arith.constant 0 : index
    %0 = vector.load %arg1[%c0, %c0_0] : memref<128x32xbf16, #tpu.memory_space<vmem>>, vector<128x32xbf16>
    %c0_1 = arith.constant 0 : index
    %c0_2 = arith.constant 0 : index
    %1 = vector.load %arg2[%c0_1, %c0_2] : memref<32x128xbf16, #tpu.memory_space<vmem>>, vector<32x128xbf16>
    %cst = arith.constant dense<0.000000e+00> : vector<128x128xf32>
    %2 = tpu.matmul %0, %1, %cst {dimension_numbers = #tpu.dot_dimension_numbers<[1], [0], [0], [1], [0, 0, 1, 1], [], []>} : vector<128x32xbf16>, vector<32x128xbf16>, vector<128x128xf32> -> vector<128x128xf32>
    %c0_3 = arith.constant 0 : index
    %c0_4 = arith.constant 0 : index
    %3 = vector.load %arg3[%c0_3, %c0_4] : memref<1x128xf32, #tpu.memory_space<vmem>>, vector<1x128xf32>
    %4 = vector.broadcast %3 : vector<1x128xf32> to vector<128x128xf32>
    %5 = arith.addf %2, %4 : vector<128x128xf32>
    %6 = arith.truncf %5 : vector<128x128xf32> to vector<128x128xbf16>
    %c0_5 = arith.constant 0 : index
    %c0_6 = arith.constant 0 : index
    %7 = vector.load %arg4[%c0_5, %c0_6] : memref<128x128xbf16, #tpu.memory_space<vmem>>, vector<128x128xbf16>
    tpu.vector_store %arg4[%c0_5, %c0_6], %6 {strides = array<i32>} : memref<128x128xbf16, #tpu.memory_space<vmem>>, vector<128x128xbf16>,
    return
  }
  func.func @transform_0(%arg0: i32) -> (i32, i32) {
    %c0_i32 = arith.constant 0 : i32
    %c0_i32_0 = arith.constant 0 : i32
    return %arg0, %c0_i32 : i32, i32
  }
  func.func @transform_1(%arg0: i32) -> (i32, i32) {
    %c0_i32 = arith.constant 0 : i32
    %c0_i32_0 = arith.constant 0 : i32
    %c0_i32_1 = arith.constant 0 : i32
    return %c0_i32, %c0_i32_0 : i32, i32
  }
  func.func @transform_2(%arg0: i32) -> (i32, i32) {
    %c0_i32 = arith.constant 0 : i32
    %c0_i32_0 = arith.constant 0 : i32
    %c0_i32_1 = arith.constant 0 : i32
    return %c0_i32, %c0_i32_0 : i32, i32
  }
  func.func @transform_3(%arg0: i32) -> (i32, i32) {
    %c0_i32 = arith.constant 0 : i32
    %c0_i32_0 = arith.constant 0 : i32
    return %arg0, %c0_i32 : i32, i32
  }
}

</mosaic_0001>

<bundles_post_ra>
// kernel: tpu_custom_call.1
= control target key start
LH: loop header
LB: loop body
LE: loop exit
PB: predicated region body
PF: predicated region fallthrough
CT: control target
= control target key end

     0   :  { %8 = vsyncpa [#allocation3], 0  ;;  %s947_s0 = inlined_call_operand.vmem [shape: bf16[256,32], index: 0, kind: input, shape index: {}]   ;;  %s948_s1 = inlined_call_operand.vmem [shape: bf16[32,128], index: 1, kind: input, shape index: {}]   ;;  %s949_s2 = inlined_call_operand.vmem [shape: f32[1,128], index: 2, kind: input, shape index: {}]   ;;  %s950_s3 = inlined_call_operand.hbm [shape: bf16[256,128], index: 3, kind: output, shape index: {}]  }
   0x1   :  { %10 = vsyncpa [#allocation3 + $0x1], 0  ;;  %s813_s12 = smov 0   ;;  %s815_s13 = smov 0  }
   0x2   :  { %s817_s14 = smov 0   ;;  %s819_s15 = smov 0  }
   0x3 LB: > { %s834_s16 = sadd.s32 4294967295, %s788_s15   ;;  %s530_s17 = sadd.s32 4294967294, %s788_s15   ;;  %s788_s15 = sphi %s819_s15, %s956_s15   ;;  %s784_s14 = sphi %s817_s14, %s955_s14   ;;  %s780_s13 = sphi %s815_s13, %s954_s13   ;;  %s776_s12 = sphi %s813_s12, %s953_s12  }
   0x4   : > { %s838_s18 = sadd.s32 1, %s788_s15   ;;  %s91_s19 = sadd.s32 1, %s784_s14 }
   0x5   : > { %s88_s20 = ssub.s32 %s788_s15, %s838_s18  ;;  %p101_p0 = scmp.ne.s32.totalorder %s784_s14, %s780_s13 }
   0x6   : > { %p89_p1 = scmp.eq.s32.totalorder %s88_s20, 0  ;;  %p102_p2 = scmp.eq.s32.totalorder %s834_s16, 1 }
   0x7   : > { %p107_p3 = scmp.ne.s32.totalorder %s780_s13, %s776_s12  ;;  %p108_p4 = scmp.eq.s32.totalorder %s530_s17, 1 }
   0x8   : > { %s849_s21 = scalar_select %p89_p1, %s784_s14, %s91_s19  }
   0x9   : > { %p851_p5 = por %p102_p2, %p101_p0  ;;  %p855_p6 = por %p108_p4, %p107_p3 }
   0xa   : > { %p533_p7 = scmp.ge.s32.totalorder %s788_s15, 1  ;;  %p141_p8 = scmp.lt.s32.totalorder %s788_s15, 3 }
   0xc   : > { %p142_p9 = pnand %p533_p7, %p141_p8 }
   0xd   : > { %v716_v0 = vld [vmem:[%s948_s1] sm:$0xff] (!%p142_p9)   ;;  %s535_s26 = sshll.u32 (!%p142_p9), %s834_s16, 4  ;;  %v717_v1 = vld [vmem:[%s948_s1 + $0x8] sm:$0xff] (!%p142_p9)   ;;  %vm252_vm0 = vcmask (!%p142_p9), 261120   ;;  %s162_s6 = sand.u32 (!%p142_p9), 1, %s780_s13  }
   0xe   : > { %145 = sbr.rel (%p142_p9) target bundleno = 269 (0x10d), region = 32  ;;  %p166_p10 = scmp.lt.s32.totalorder (!%p142_p9), %s535_s26, 31  ;;  %651 = vmatprep.subr.bf16.mxu0 (!%p142_p9), %v716_v0  ;;  %671 = vmatprep.subr.bf16.mxu1 (!%p142_p9), %v716_v0  ;;  %v537_v11 = vld [vmem:[%s949_s2] ss:$0 sm:$0xff] (!%p142_p9) }
   0xf   : > { %652 = vmatpush3.bf16.msra.mxu0 (!%p142_p9), %v716_v0  ;;  %673 = vmatpush3.bf16.msra.mxu1 (!%p142_p9), %v716_v0  ;;  %s534_s9 = sshll.u32 (!%p142_p9), %s162_s6, 6  ;;  %s593_s11 = sshll.u32 (!%p142_p9), %s834_s16, 10 }
  0x10   : > { %653 = vmatprep.subr.bf16.mxu0 (!%p142_p9), %v717_v1  ;;  %672 = vmatprep.subr.bf16.mxu1 (!%p142_p9), %v717_v1  ;;  %s885_s10 = scalar_lea.vmem (!%p142_p9), [#allocation2], %s534_s9  ;;  %s896_s16 = scalar_lea.hbm (!%p142_p9), %s950_s3, %s593_s11 }
  0x11   : > { %s468_s17 = sshll.u32 (!%p142_p9), %s885_s10, 4  ;;  %s906_s24 = scalar_lea.sflag (!%p142_p9), [#allocation3], %s162_s6  ;;  %s898_s17 = int_to_ptr.vmem [resolvable:$true] %s468_s17 }
  0x12   : > { %s726_s25 = scalar_lea.vmem (!%p142_p9), %s898_s17, 1024 }
  0x13   : > { %654 = vmatpush3.bf16.msra.mxu0 (!%p142_p9), %v717_v1  ;;  %674 = vmatpush3.bf16.msra.mxu1 (!%p142_p9), %v717_v1  ;;  %p727_p11 = scmp.ne.s32.totalorder (!%p142_p9), %s898_s17, %s726_s25 }
  0x15   : > { %s958_s26 = smov (!%p166_p10, %s535_s26), 31  ;;  %p728_p12 = pnand %p727_p11, %p851_p5 }
  0x16   : > { %s536_s29 = sshll.u32 %s958_s26, 2  ;;  %s790_s26 = smov [#allocation2]  }
  0x17   : > { %s169_s5 = scalar_lea.vmem %s947_s0, %s536_s29  ;;  %p729_p13 = pneg %p728_p12 }
  0x18   : > { %v718_v2 = vld [vmem:[%s169_s5] sm:$0xff]   ;;  %v720_v4 = vld [vmem:[%s169_s5 + $0x8] sm:$0xff]   ;;  %v722_v6 = vld [vmem:[%s169_s5 + $0x10] sm:$0xff]   ;;  %s730_s27 = sshll.u32 %s790_s26, 4  ;;  %s731_s27 = int_to_ptr.vmem [resolvable:$false] %s730_s27 }
  0x19   : > { %v719_v3 = vld [vmem:[%s169_s5 + $0x20] sm:$0xff]   ;;  %655 = vmatprep.mubr.msk.bf16.mxu0 %vm252_vm0, %v718_v2  ;;  %v721_v5 = vld [vmem:[%s169_s5 + $0x28] sm:$0xff]   ;;  %v723_v7 = vld [vmem:[%s169_s5 + $0x30] sm:$0xff]   ;;  %s732_s28 = scalar_lea.vmem %s731_s27, 2048  ;;  %p733_p0 = scmp.lt.s32.totalorder %s898_s17, %s731_s27 }
  0x1a   : > { %663 = vmatprep.mubr.msk.bf16.mxu1 %vm252_vm0, %v719_v3  ;;  %656 = vmatmul.mubr.msk.bf16.vlgmr.msra.gmra.mrb[0].mxu0 %vm252_vm0, %v720_v4  ;;  %v724_v8 = vld [vmem:[%s169_s5 + $0x18] sm:$0xff]   ;;  %p734_p1 = scmp.lt.s32.totalorder %s732_s28, %s726_s25 }
  0x1b   : > { %664 = vmatmul.mubr.msk.bf16.vlgmr.msra.gmra.mrb[0].mxu1 %vm252_vm0, %v721_v5  ;;  %659 = vmatprep.mubr.msk.bf16.mxu0 %vm252_vm0, %v722_v6  ;;  %v725_v9 = vld [vmem:[%s169_s5 + $0x38] sm:$0xff]  }
  0x1c   : > { %667 = vmatprep.mubr.msk.bf16.mxu1 %vm252_vm0, %v723_v7  ;;  %p735_p2 = por %p734_p1, %p733_p0 }
  0x1e   : > { %p736_p3 = pnand %p735_p2, %p729_p13 }
  0x22   : > { %660 = vmatmul.mubr.msk.bf16.gmra.mrb[4].mxu0 %vm252_vm0, %v724_v8 }
  0x23   : > { %668 = vmatmul.mubr.msk.bf16.gmra.mrb[4].mxu1 %vm252_vm0, %v725_v9 }
  0xed   : > { %v657_v10 = vpop.f32.mrb[0].mxu0 }
  0xee   : > { %v665_v12 = vpop.f32.mrb[0].mxu1  ;;  %v311_v13 = vpop.f32.mrb[1].mxu0  ;;  %v320_v16 = vadd.f32 %v657_v10, %v537_v11 }
  0xef   : > { %v343_v14 = vpop.f32.mrb[1].mxu1  ;;  %v658_v15 = vpop.f32.mrb[2].mxu0  ;;  %v352_v20 = vadd.f32 %v665_v12, %v537_v11  ;;  %v312_v21 = vadd.f32 %v537_v11, %v311_v13 }
  0xf0   : > { %v323_v17 = vadd.f32 %v658_v15, %v537_v11  ;;  %v666_v18 = vpop.f32.mrb[2].mxu1  ;;  %v314_v19 = vpop.f32.mrb[3].mxu0  ;;  %v344_v25 = vadd.f32 %v537_v11, %v343_v14 }
  0xf1   : > { %v355_v22 = vadd.f32 %v666_v18, %v537_v11  ;;  %v315_v23 = vadd.f32 %v537_v11, %v314_v19  ;;  %v346_v24 = vpop.f32.mrb[3].mxu1 }
  0xf2   : > { %v602_v26 = vpack.c.bf16 %v323_v17, %v320_v16  ;;  %v347_v27 = vadd.f32 %v537_v11, %v346_v24 }
  0xf3   : > { %v622_v28 = vpack.c.bf16 %v355_v22, %v352_v20  ;;  %v597_v29 = vpack.c.bf16 %v315_v23, %v312_v21 }
  0xf4   : > { %634 = vst [vmem:[%s885_s10 + $0x8] sm:$0xff] %v602_v26   ;;  %v617_v30 = vpack.c.bf16 %v347_v27, %v344_v25 }
  0xf5   : > { %638 = vst [vmem:[%s885_s10 + $0x28] sm:$0xff] %v622_v28   ;;  %598 = vst [vmem:[%s885_s10] sm:$0xff] %v597_v29   ;;  %v661_v31 = vpop.f32.mrb[4].mxu0 }
  0xf6   : > { %637 = vst [vmem:[%s885_s10 + $0x20] sm:$0xff] %v617_v30   ;;  %v669_v32 = vpop.f32.mrb[4].mxu1  ;;  %v327_v33 = vpop.f32.mrb[5].mxu0  ;;  %v336_v36 = vadd.f32 %v661_v31, %v537_v11 }
  0xf7   : > { %v359_v34 = vpop.f32.mrb[5].mxu1  ;;  %v662_v35 = vpop.f32.mrb[6].mxu0  ;;  %v368_v40 = vadd.f32 %v669_v32, %v537_v11  ;;  %v328_v41 = vadd.f32 %v537_v11, %v327_v33 }
  0xf8   : > { %v339_v37 = vadd.f32 %v662_v35, %v537_v11  ;;  %v670_v38 = vpop.f32.mrb[6].mxu1  ;;  %v330_v39 = vpop.f32.mrb[7].mxu0  ;;  %v360_v45 = vadd.f32 %v537_v11, %v359_v34 }
  0xf9   : > { %v371_v42 = vadd.f32 %v670_v38, %v537_v11  ;;  %v331_v43 = vadd.f32 %v537_v11, %v330_v39  ;;  %v362_v44 = vpop.f32.mrb[7].mxu1 }
  0xfa   : > { %v612_v46 = vpack.c.bf16 %v339_v37, %v336_v36  ;;  %v363_v47 = vadd.f32 %v537_v11, %v362_v44 }
  0xfb   : > { %v632_v48 = vpack.c.bf16 %v371_v42, %v368_v40  ;;  %v607_v49 = vpack.c.bf16 %v331_v43, %v328_v41 }
  0xfc   : > { %636 = vst [vmem:[%s885_s10 + $0x18] sm:$0xff] %v612_v46   ;;  %v627_v50 = vpack.c.bf16 %v363_v47, %v360_v45 }
  0xfd   : > { %640 = vst [vmem:[%s885_s10 + $0x38] sm:$0xff] %v632_v48   ;;  %635 = vst [vmem:[%s885_s10 + $0x10] sm:$0xff] %v607_v49  }
  0xfe   : > { %639 = vst [vmem:[%s885_s10 + $0x30] sm:$0xff] %v627_v50  }
  0xff   : > { %739 = shalt.err (!%p736_p3)
}
 0x100   : > { %s740_s29 = scalar_lea.hbm %s896_s16, 1024  ;;  %s744_s5 = scalar_lea.hbm %s950_s3, 2048 }
 0x101   : > { %p741_p4 = scmp.ne.s32.totalorder %s896_s16, %s740_s29  ;;  %p745_p9 = scmp.lt.u32.totalorder %s896_s16, %s950_s3 }
 0x102   : > { %p746_p10 = scmp.lt.u32.totalorder %s744_s5, %s740_s29  ;;  %p748_p12 = scmp.lt.u32.totalorder %s740_s29, %s896_s16 }
 0x103   : > { %p742_p7 = pnand %p741_p4, %p851_p5 }
 0x104   : > { %p747_p11 = por %p746_p10, %p745_p9 }
 0x105   : > { %p743_p8 = pneg %p742_p7 }
 0x106   : > { %p749_p13 = por %p748_p12, %p747_p11 }
 0x108   : > { %p750_p0 = pnand %p749_p13, %p743_p8 }
 0x10a   : > { %753 = shalt.err (!%p750_p0)
}
 0x10b   : > { %s791_s8 = smov 64   ;;  %s792_s9 = smov 4  }
 0x10c   : > { %675 = dma.vmem_to_hbm [thread:$0]  (%p851_p5), %s898_s17, 1024, %s896_s16, %s906_s24, %s791_s8, %s791_s8, %s792_s9  }
 0x10d PF: > { %p681_p1 = scmp.ge.s32.totalorder %s788_s15, 2  ;;  %s483_s10 = sand.u32 1, %s776_s12  }
 0x10e   : > { %s484_s11 = scalar_lea.sflag [#allocation3], %s483_s10 }
 0x10f   : > { %p678_p2 = pnand %p681_p1, %p855_p6 }
 0x111   : > { %771 = dma.done.wait (!%p678_p2), %s484_s11, 1024  }
 0x112   : > { %773 = vsyncadd (!%p678_p2), %s484_s11, 4294966272  ;;  %p13_p3 = scmp.ge.s32.totalorder %s838_s18, 4   ;;  %s953_s12 = smov %s780_s13 }
 0x113   : > { %s954_s13 = smov %s784_s14  ;;  %s955_s14 = smov %s849_s21 }
 0x114   : > { %s956_s15 = smov %s838_s18  ;;  %15 = sbr.rel (!%p13_p3) target bundleno = 3 (0x3), region = 67 }
 0x11b   :  { %489 = vsyncpa [#allocation3], 1 }
 0x11c   :  { %491 = vsyncpa [#allocation3 + $0x1], 1 }

</bundles_post_ra>
